<compile_context>
chip_gen: v5e
topology: v5e:2x2
jax: 0.10.0
libtpu: 0.0.40
codegen_flags: <defaults>
</compile_context>

<pallas_src>
import functools

import jax
import jax.numpy as jnp
from jax.experimental import pallas as pl
from jax.experimental.pallas import tpu as pltpu


# ---------------------------------------------------------------------------
# Shared gate math (runs on a tiny (TB, C) pooled slab, all f32).
# ---------------------------------------------------------------------------
def _gate(y, w1p, sel, w2t, g, beta, mid):
    """Pooled features (TB, C) f32 -> sigmoid gate (TB, C) f32.

    Reshape-free fc1 bilinear form: w1p is fc1_w pre-permuted so that
    v[b, m*C + c] == weight[b, c, m]; the second contraction over C is an
    elementwise multiply plus a tiny group-sum selection matmul (mid*C, mid).
    """
    hi = jax.lax.Precision.HIGHEST   # gate is negligible flops; keep f32-exact
    v = jnp.dot(y.astype(w1p.dtype), w1p,
                preferred_element_type=jnp.float32, precision=hi)    # (TB, mid*C)
    yt = jnp.concatenate([y] * mid, axis=1)                          # (TB, mid*C)
    y2 = jnp.dot(v * yt, sel,
                 preferred_element_type=jnp.float32, precision=hi)   # (TB, mid)
    # LayerNorm(mid) + ReLU
    mu = jnp.mean(y2, axis=1, keepdims=True)
    var = jnp.mean((y2 - mu) ** 2, axis=1, keepdims=True)
    yn = (y2 - mu) * jax.lax.rsqrt(var + 1e-5)
    yn = jnp.maximum(yn * g + beta, 0.0)
    # fc2 (Linear(mid, C, bias=False)) + Sigmoid
    return jax.nn.sigmoid(jnp.dot(yn.astype(w2t.dtype), w2t,
                                  preferred_element_type=jnp.float32,
                                  precision=hi))                     # (TB, C)


# ---------------------------------------------------------------------------
# Single-pass kernel: the whole (TB, C, HW) slab fits the VMEM budget.
# ---------------------------------------------------------------------------
def _fused_kernel(x_ref, w1p_ref, sel_ref, w2t_ref, g_ref, b_ref, o_ref,
                  *, inv_hw, mid):
    x = x_ref[...]                                       # (TB, C, HW), native dtype
    # AdaptiveAvgPool2d(1): f32-accumulating sum, no f32 copy of the slab.
    y = jnp.sum(x, axis=2, dtype=jnp.float32) * inv_hw   # (TB, C)
    y3 = _gate(y, w1p_ref[...], sel_ref[...], w2t_ref[...],
               g_ref[...], b_ref[...], mid)
    # Channel-wise rescale in x's native dtype (bf16 stays bf16 on the VALU).
    o_ref[...] = (x * y3.astype(x.dtype)[:, :, None]).astype(o_ref.dtype)


# ---------------------------------------------------------------------------
# Two-pass kernels: HW too large for one slab (e.g. production FPN on v7x).
# ---------------------------------------------------------------------------
def _pool_gate_kernel(x_ref, w1p_ref, sel_ref, w2t_ref, g_ref, b_ref,
                      y3_ref, acc_ref, *, inv_hw, mid, hw, thw):
    j = pl.program_id(1)
    nj = pl.num_programs(1)

    @pl.when(j == 0)
    def _():
        acc_ref[...] = jnp.zeros_like(acc_ref)

    @pl.when(j < nj - 1)
    def _():
        acc_ref[...] += jnp.sum(x_ref[...], axis=2, dtype=jnp.float32)

    @pl.when(j == nj - 1)
    def _():
        x = x_ref[...]
        if hw % thw:  # static: last HW tile is ragged -> mask out-of-bounds lanes
            lane = jax.lax.broadcasted_iota(jnp.int32, x.shape, 2)
            x = jnp.where(lane < (hw - j * thw), x, jnp.zeros_like(x))
        y = (acc_ref[...] + jnp.sum(x, axis=2, dtype=jnp.float32)) * inv_hw
        y3 = _gate(y, w1p_ref[...], sel_ref[...], w2t_ref[...],
                   g_ref[...], b_ref[...], mid)
        y3_ref[...] = y3[:, :, None]


def _rescale_kernel(x_ref, y3_ref, o_ref):
    x = x_ref[...]                                              # (TB, C, THW)
    o_ref[...] = (x * y3_ref[...].astype(x.dtype)).astype(o_ref.dtype)


# ---------------------------------------------------------------------------
# Wrapper
# ---------------------------------------------------------------------------
def _tpu_arch_info():
    """Returns (num_tensorcores, vmem_limit_ceiling_bytes, block_cap_bytes)."""
    kind = ""
    try:
        kind = jax.devices()[0].device_kind.lower()
    except Exception:
        pass
    is_v7 = "7" in kind
    try:
        vmem_cap = int(pltpu.get_tpu_info().vmem_capacity_bytes)
    except Exception:
        vmem_cap = (64 << 20) if is_v7 else (128 << 20)
    num_cores = 2 if is_v7 else 1
    if vmem_cap <= (64 << 20):
        # v7x-class: 64 MiB/TC -> ~6 MiB x-blocks, keep headroom for Mosaic scratch.
        return num_cores, 48 << 20, 6 << 20
    # v5e / v6e: 128 MiB physical -> bigger blocks and ceiling.
    return num_cores, 96 << 20, 8 << 20


def dynamic_attention(x, fc1_w, fc2_w, ln_gamma, ln_beta, dynamic_heads=16,
                      *, block_cap_bytes=None, donate_x=False):
    """x: (B, C, H, W) NCHW (same convention as the PyTorch module)."""
    b, c, h, w = x.shape
    mid = dynamic_heads
    hw = h * w
    assert fc1_w.shape == (c * mid, c)
    assert fc2_w.shape == (c, mid)

    x_bytes = jnp.dtype(x.dtype).itemsize
    num_cores, vmem_ceiling, default_cap = _tpu_arch_info()
    block_cap = int(block_cap_bytes) if block_cap_bytes else default_cap

    # No host-side pad: the kernel sees the true (B, C, HW) layout; the pooled
    # mean divides by the true HW.
    x2 = x.reshape(b, c, hw)

    # Weight layouts for reshape-free MXU contractions (built once, in XLA).
    # w1p[c', m*C + c] = fc1_w[c*mid + m, c']; sel groups the mid*C lanes by m.
    w1p = jnp.transpose(fc1_w.reshape(c, mid, c), (2, 1, 0)).reshape(c, mid * c)
    sel = jnp.repeat(jnp.eye(mid, dtype=jnp.float32), c, axis=0)       # (mid*C, mid)
    w2t = fc2_w.T                                                      # (mid, C)
    g2 = ln_gamma.reshape(1, mid).astype(jnp.float32)
    bt2 = ln_beta.reshape(1, mid).astype(jnp.float32)
    gate_args = (w1p, sel, w2t, g2, bt2)
    gate_shapes = [(c, mid * c), (mid * c, mid), (mid, c), (1, mid), (1, mid)]
    w_bytes = sum(int(a.size) * a.dtype.itemsize for a in gate_args)
    # TODO(synk): use pipeline_mode=pl.Buffered(1) on the constant-index weight
    # specs once verified on this jax version, to reclaim their double-buffer VMEM.

    c_pad = -(-c // 8) * 8
    hw_lanes = -(-hw // 128) * 128                 # VMEM footprint of the HW axis
    per_batch_bytes = c_pad * hw_lanes * x_bytes
    gate_flops = 2 * mid * c * c + 2 * mid * mid * c + 3 * mid * c + 8 * mid
    inv_hw = 1.0 / float(hw)

    if per_batch_bytes <= block_cap:
        # ------------------------- single fused pass -------------------------
        tb = min(b, max(1, block_cap // per_batch_bytes))
        if num_cores >= 2 and b >= 2:
            tb = min(tb, -(-b // 2))       # keep >=2 grid blocks only on megacore
        grid = (pl.cdiv(b, tb),)

        blk_bytes = tb * per_batch_bytes
        vmem_need = 4 * blk_bytes + 2 * w_bytes + (2 << 20)
        vmem_limit = int(min(max(vmem_need, 16 << 20), vmem_ceiling))

        kernel = functools.partial(_fused_kernel, inv_hw=inv_hw, mid=mid)
        out = pl.pallas_call(
            kernel,
            out_shape=jax.ShapeDtypeStruct((b, c, hw), x.dtype),
            grid=grid,
            in_specs=[pl.BlockSpec((tb, c, hw), lambda i: (i, 0, 0))]
                     + [pl.BlockSpec(s, lambda i: (0, 0)) for s in gate_shapes],
            out_specs=pl.BlockSpec((tb, c, hw), lambda i: (i, 0, 0)),
            compiler_params=pltpu.CompilerParams(
                dimension_semantics=("parallel",),
                vmem_limit_bytes=vmem_limit),
            cost_estimate=pl.CostEstimate(
                flops=int(b * (2 * c * hw + gate_flops)),
                transcendentals=int(b * (c + mid)),
                bytes_accessed=int(2 * b * c * hw * x_bytes + w_bytes)),
            input_output_aliases=({0: 0} if donate_x else {}),
        )(x2, *gate_args)
        return out.reshape(b, c, h, w)

    # -------- two passes: pooled-gate reduction, then lane-tiled rescale --------
    thw = max(128, min((block_cap // (c_pad * x_bytes)) // 128 * 128, hw_lanes))
    tb = min(b, max(1, block_cap // (c_pad * thw * x_bytes)))
    n_hw = pl.cdiv(hw, thw)
    grid = (pl.cdiv(b, tb), n_hw)

    blk_bytes = tb * c_pad * thw * x_bytes
    vmem_need = 4 * blk_bytes + 2 * w_bytes + (2 << 20)
    vmem_limit = int(min(max(vmem_need, 16 << 20), vmem_ceiling))

    gate_kernel = functools.partial(_pool_gate_kernel, inv_hw=inv_hw, mid=mid,
                                    hw=hw, thw=thw)
    y3 = pl.pallas_call(
        gate_kernel,
        out_shape=jax.ShapeDtypeStruct((b, c, 1), jnp.float32),
        grid=grid,
        in_specs=[pl.BlockSpec((tb, c, thw), lambda i, j: (i, 0, j))]
                 + [pl.BlockSpec(s, lambda i, j: (0, 0)) for s in gate_shapes],
        out_specs=pl.BlockSpec((tb, c, 1), lambda i, j: (i, 0, 0)),
        scratch_shapes=[pltpu.VMEM((tb, c), jnp.float32)],
        compiler_params=pltpu.CompilerParams(
            dimension_semantics=("parallel", "arbitrary"),
            vmem_limit_bytes=vmem_limit),
        cost_estimate=pl.CostEstimate(
            flops=int(b * (c * hw + gate_flops)),
            transcendentals=int(b * (c + mid)),
            bytes_accessed=int(b * c * hw * x_bytes + w_bytes)),
    )(x2, *gate_args)

    out = pl.pallas_call(
        _rescale_kernel,
        out_shape=jax.ShapeDtypeStruct((b, c, hw), x.dtype),
        grid=grid,
        in_specs=[pl.BlockSpec((tb, c, thw), lambda i, j: (i, 0, j)),
                  pl.BlockSpec((tb, c, 1), lambda i, j: (i, 0, 0))],
        out_specs=pl.BlockSpec((tb, c, thw), lambda i, j: (i, 0, j)),
        compiler_params=pltpu.CompilerParams(
            dimension_semantics=("parallel", "parallel"),
            vmem_limit_bytes=vmem_limit),
        cost_estimate=pl.CostEstimate(
            flops=int(b * c * hw), transcendentals=0,
            bytes_accessed=int(2 * b * c * hw * x_bytes + b * c * 4)),
        input_output_aliases=({0: 0} if donate_x else {}),
    )(x2, y3)
    return out.reshape(b, c, h, w)


# ---------------------------------------------------------------------------
# Pure-JAX reference of the PyTorch forward (for validation only).
# ---------------------------------------------------------------------------
def reference(x, fc1_w, fc2_w, ln_gamma, ln_beta, mid):
    b, c, h, w = x.shape
    hi = jax.lax.Precision.HIGHEST
    xf = x.astype(jnp.float32)
    y = xf.mean(axis=(2, 3))                                        # (b, c)
    weight = jnp.dot(y, fc1_w.astype(jnp.float32).T,
                     precision=hi).reshape(b, c, mid)               # (b, c, mid)
    y2 = jnp.einsum('bc,bcm->bm', y, weight, precision=hi)          # (b, mid)
    mu = y2.mean(-1, keepdims=True)
    var = ((y2 - mu) ** 2).mean(-1, keepdims=True)                  # biased, like nn.LayerNorm
    y2 = (y2 - mu) / jnp.sqrt(var + 1e-5) * ln_gamma + ln_beta
    y2 = jnp.maximum(y2, 0.0)
    y3 = jax.nn.sigmoid(jnp.dot(y2, fc2_w.astype(jnp.float32).T, precision=hi))
    return xf * y3[:, :, None, None]


if __name__ == "__main__":
    C, MID = 4, 16
    key = jax.random.PRNGKey(0)
    kx, k1, k2 = jax.random.split(key, 3)

    # Deterministic synthetic parameters (shapes match the PyTorch __init__).
    fc1_w = jax.random.normal(k1, (C * MID, C), dtype=jnp.float32) * 0.1
    fc2_w = jax.random.normal(k2, (C, MID), dtype=jnp.float32) * 0.1
    ln_gamma = jnp.ones((MID,), dtype=jnp.float32)
    ln_beta = jnp.zeros((MID,), dtype=jnp.float32)

    def run(xin, **kw):
        return jax.block_until_ready(
            dynamic_attention(xin, fc1_w, fc2_w, ln_gamma, ln_beta,
                              dynamic_heads=MID, **kw))

    # 1) lane-aligned HW (16*16 = 256): fused single-pass path.
    x1 = jax.random.normal(kx, (2, C, 16, 16), dtype=jnp.float32)
    o1 = run(x1)
    assert o1.shape == x1.shape
    assert jnp.allclose(o1, reference(x1, fc1_w, fc2_w, ln_gamma, ln_beta, MID),
                        rtol=1e-5, atol=2e-5), "mismatch (16x16 fused)"

    # 2) non-128-multiple HW (13*13 = 169): unpadded fused path (masked vst only).
    x2 = jax.random.normal(kx, (2, C, 13, 13), dtype=jnp.float32)
    o2 = run(x2)
    assert jnp.allclose(o2, reference(x2, fc1_w, fc2_w, ln_gamma, ln_beta, MID),
                        rtol=1e-5, atol=2e-5), "mismatch (13x13 fused)"

    # 3) ragged batch tiling (B=3 forced to TB=2 via a small block cap).
    x3 = jax.random.normal(kx, (3, C, 13, 13), dtype=jnp.float32)
    o3 = run(x3, block_cap_bytes=16 << 10)
    assert jnp.allclose(o3, reference(x3, fc1_w, fc2_w, ln_gamma, ln_beta, MID),
                        rtol=1e-5, atol=2e-5), "mismatch (ragged batch)"

    # 4) large-HW two-pass path (forced via a tiny block cap): 45*45 = 2025,
    #    multi-tile HW reduction with a ragged, non-128-aligned last tile.
    x4 = jax.random.normal(kx, (2, C, 45, 45), dtype=jnp.float32)
    o4 = run(x4, block_cap_bytes=16 << 10)
    assert jnp.allclose(o4, reference(x4, fc1_w, fc2_w, ln_gamma, ln_beta, MID),
                        rtol=1e-5, atol=2e-5), "mismatch (two-pass)"

    # 5) bf16 activations stay bf16 on the streaming path.
    x5 = jax.random.normal(kx, (2, C, 16, 16), dtype=jnp.bfloat16)
    o5 = run(x5)
    assert o5.dtype == jnp.bfloat16
    assert jnp.allclose(o5.astype(jnp.float32),
                        reference(x5, fc1_w, fc2_w, ln_gamma, ln_beta, MID),
                        rtol=5e-2, atol=5e-2), "mismatch (bf16)"

    print("KERNEL_OK")
</pallas_src>

<mosaic_0001>
module attributes {stable_mosaic.version = 11 : i64} {
  func.func @_fused_kernel(%arg0: i32, %arg1: memref<2x4x256xf32, #tpu.memory_space<vmem>>, %arg2: memref<4x64xf32, #tpu.memory_space<vmem>>, %arg3: memref<64x16xf32, #tpu.memory_space<vmem>>, %arg4: memref<16x4xf32, #tpu.memory_space<vmem>>, %arg5: memref<1x16xf32, #tpu.memory_space<vmem>>, %arg6: memref<1x16xf32, #tpu.memory_space<vmem>>, %arg7: memref<2x4x256xf32, #tpu.memory_space<vmem>>) attributes {dimension_semantics = [#tpu.dimension_semantics<parallel>], iteration_bounds = array<i64: 1>, scalar_prefetch = 0 : i64, scratch_operands = 0 : i64, tpu.core_type = #tpu.core_type<tc>, window_params = [{transform_indices = @transform_0, window_bounds = array<i64: 2, 4, 256>}, {pipeline_mode = #tpu.pipeline_mode<synchronous>, transform_indices = @transform_1, window_bounds = array<i64: 4, 64>}, {pipeline_mode = #tpu.pipeline_mode<synchronous>, transform_indices = @transform_2, window_bounds = array<i64: 64, 16>}, {pipeline_mode = #tpu.pipeline_mode<synchronous>, transform_indices = @transform_3, window_bounds = array<i64: 16, 4>}, {pipeline_mode = #tpu.pipeline_mode<synchronous>, transform_indices = @transform_4, window_bounds = array<i64: 1, 16>}, {pipeline_mode = #tpu.pipeline_mode<synchronous>, transform_indices = @transform_5, window_bounds = array<i64: 1, 16>}, {transform_indices = @transform_6, window_bounds = array<i64: 2, 4, 256>}]} {
    %c0 = arith.constant 0 : index
    %c0_0 = arith.constant 0 : index
    %c0_1 = arith.constant 0 : index
    %0 = vector.load %arg1[%c0, %c0_0, %c0_1] : memref<2x4x256xf32, #tpu.memory_space<vmem>>, vector<2x4x256xf32>
    %cst = arith.constant dense<0.000000e+00> : vector<2x4xf32>
    %1 = vector.multi_reduction <add>, %0, %cst [2] : vector<2x4x256xf32> to vector<2x4xf32>
    %cst_2 = arith.constant 3.906250e-03 : f32
    %2 = vector.broadcast %cst_2 : f32 to vector<2x4xf32>
    %3 = arith.mulf %1, %2 : vector<2x4xf32>
    %c0_3 = arith.constant 0 : index
    %c0_4 = arith.constant 0 : index
    %4 = vector.load %arg2[%c0_3, %c0_4] : memref<4x64xf32, #tpu.memory_space<vmem>>, vector<4x64xf32>
    %c0_5 = arith.constant 0 : index
    %c0_6 = arith.constant 0 : index
    %5 = vector.load %arg3[%c0_5, %c0_6] : memref<64x16xf32, #tpu.memory_space<vmem>>, vector<64x16xf32>
    %c0_7 = arith.constant 0 : index
    %c0_8 = arith.constant 0 : index
    %6 = vector.load %arg4[%c0_7, %c0_8] : memref<16x4xf32, #tpu.memory_space<vmem>>, vector<16x4xf32>
    %c0_9 = arith.constant 0 : index
    %c0_10 = arith.constant 0 : index
    %7 = vector.load %arg5[%c0_9, %c0_10] : memref<1x16xf32, #tpu.memory_space<vmem>>, vector<1x16xf32>
    %c0_11 = arith.constant 0 : index
    %c0_12 = arith.constant 0 : index
    %8 = vector.load %arg6[%c0_11, %c0_12] : memref<1x16xf32, #tpu.memory_space<vmem>>, vector<1x16xf32>
    %cst_13 = arith.constant dense<0.000000e+00> : vector<2x64xf32>
    %9 = tpu.matmul %3, %4, %cst_13 {dimension_numbers = #tpu.dot_dimension_numbers<[1], [0], [0], [1], [0, 0, 1, 1], [], []>, precision = #tpu.contract_precision<fp32>} : vector<2x4xf32>, vector<4x64xf32>, vector<2x64xf32> -> vector<2x64xf32>
    %10 = tpu.concatenate %3, %3, %3, %3, %3, %3, %3, %3, %3, %3, %3, %3, %3, %3, %3, %3 in 1 : vector<2x4xf32>, vector<2x4xf32>, vector<2x4xf32>, vector<2x4xf32>, vector<2x4xf32>, vector<2x4xf32>, vector<2x4xf32>, vector<2x4xf32>, vector<2x4xf32>, vector<2x4xf32>, vector<2x4xf32>, vector<2x4xf32>, vector<2x4xf32>, vector<2x4xf32>, vector<2x4xf32>, vector<2x4xf32> -> vector<2x64xf32>
    %11 = arith.mulf %9, %10 : vector<2x64xf32>
    %cst_14 = arith.constant dense<0.000000e+00> : vector<2x16xf32>
    %12 = tpu.matmul %11, %5, %cst_14 {dimension_numbers = #tpu.dot_dimension_numbers<[1], [0], [0], [1], [0, 0, 1, 1], [], []>, precision = #tpu.contract_precision<fp32>} : vector<2x64xf32>, vector<64x16xf32>, vector<2x16xf32> -> vector<2x16xf32>
    %cst_15 = arith.constant dense<0.000000e+00> : vector<2xf32>
    %13 = vector.multi_reduction <add>, %12, %cst_15 [1] : vector<2x16xf32> to vector<2xf32>
    %14 = vector.shape_cast %13 : vector<2xf32> to vector<2x1xf32>
    %cst_16 = arith.constant 1.600000e+01 : f32
    %15 = vector.broadcast %cst_16 : f32 to vector<2x1xf32>
    %16 = arith.divf %14, %15 : vector<2x1xf32>
    %17 = vector.broadcast %16 : vector<2x1xf32> to vector<2x16xf32>
    %18 = arith.subf %12, %17 : vector<2x16xf32>
    %19 = arith.mulf %18, %18 : vector<2x16xf32>
    %cst_17 = arith.constant dense<0.000000e+00> : vector<2xf32>
    %20 = vector.multi_reduction <add>, %19, %cst_17 [1] : vector<2x16xf32> to vector<2xf32>
    %21 = vector.shape_cast %20 : vector<2xf32> to vector<2x1xf32>
    %cst_18 = arith.constant 1.600000e+01 : f32
    %22 = vector.broadcast %cst_18 : f32 to vector<2x1xf32>
    %23 = arith.divf %21, %22 : vector<2x1xf32>
    %24 = vector.broadcast %16 : vector<2x1xf32> to vector<2x16xf32>
    %25 = arith.subf %12, %24 : vector<2x16xf32>
    %cst_19 = arith.constant 9.99999974E-6 : f32
    %26 = vector.broadcast %cst_19 : f32 to vector<2x1xf32>
    %27 = arith.addf %23, %26 : vector<2x1xf32>
    %28 = math.rsqrt %27 : vector<2x1xf32>
    %29 = vector.broadcast %28 : vector<2x1xf32> to vector<2x16xf32>
    %30 = arith.mulf %25, %29 : vector<2x16xf32>
    %31 = vector.broadcast %7 : vector<1x16xf32> to vector<2x16xf32>
    %32 = arith.mulf %30, %31 : vector<2x16xf32>
    %33 = vector.broadcast %8 : vector<1x16xf32> to vector<2x16xf32>
    %34 = arith.addf %32, %33 : vector<2x16xf32>
    %cst_20 = arith.constant 0.000000e+00 : f32
    %35 = vector.broadcast %cst_20 : f32 to vector<2x16xf32>
    %36 = arith.maximumf %34, %35 : vector<2x16xf32>
    %cst_21 = arith.constant dense<0.000000e+00> : vector<2x4xf32>
    %37 = tpu.matmul %36, %6, %cst_21 {dimension_numbers = #tpu.dot_dimension_numbers<[1], [0], [0], [1], [0, 0, 1, 1], [], []>, precision = #tpu.contract_precision<fp32>} : vector<2x16xf32>, vector<16x4xf32>, vector<2x4xf32> -> vector<2x4xf32>
    %38 = arith.negf %37 : vector<2x4xf32>
    %39 = math.exp %38 : vector<2x4xf32>
    %cst_22 = arith.constant 1.000000e+00 : f32
    %40 = vector.broadcast %cst_22 : f32 to vector<2x4xf32>
    %41 = arith.addf %40, %39 : vector<2x4xf32>
    %42 = arith.divf %40, %41 : vector<2x4xf32>
    %43 = vector.shape_cast %42 : vector<2x4xf32> to vector<2x4x1xf32>
    %44 = vector.broadcast %43 : vector<2x4x1xf32> to vector<2x4x256xf32>
    %45 = arith.mulf %0, %44 : vector<2x4x256xf32>
    %c0_23 = arith.constant 0 : index
    %c0_24 = arith.constant 0 : index
    %c0_25 = arith.constant 0 : index
    %46 = vector.load %arg7[%c0_23, %c0_24, %c0_25] : memref<2x4x256xf32, #tpu.memory_space<vmem>>, vector<2x4x256xf32>
    tpu.vector_store %arg7[%c0_23, %c0_24, %c0_25], %45 {strides = array<i32>} : memref<2x4x256xf32, #tpu.memory_space<vmem>>, vector<2x4x256xf32>,
    return
  }
  func.func @transform_0(%arg0: i32) -> (i32, i32, i32) {
    %c0_i32 = arith.constant 0 : i32
    %c0_i32_0 = arith.constant 0 : i32
    %c0_i32_1 = arith.constant 0 : i32
    return %arg0, %c0_i32, %c0_i32_0 : i32, i32, i32
  }
  func.func @transform_1(%arg0: i32) -> (i32, i32) {
    %c0_i32 = arith.constant 0 : i32
    %c0_i32_0 = arith.constant 0 : i32
    %c0_i32_1 = arith.constant 0 : i32
    return %c0_i32, %c0_i32_0 : i32, i32
  }
  func.func @transform_2(%arg0: i32) -> (i32, i32) {
    %c0_i32 = arith.constant 0 : i32
    %c0_i32_0 = arith.constant 0 : i32
    %c0_i32_1 = arith.constant 0 : i32
    return %c0_i32, %c0_i32_0 : i32, i32
  }
  func.func @transform_3(%arg0: i32) -> (i32, i32) {
    %c0_i32 = arith.constant 0 : i32
    %c0_i32_0 = arith.constant 0 : i32
    %c0_i32_1 = arith.constant 0 : i32
    return %c0_i32, %c0_i32_0 : i32, i32
  }
  func.func @transform_4(%arg0: i32) -> (i32, i32) {
    %c0_i32 = arith.constant 0 : i32
    %c0_i32_0 = arith.constant 0 : i32
    %c0_i32_1 = arith.constant 0 : i32
    return %c0_i32, %c0_i32_0 : i32, i32
  }
  func.func @transform_5(%arg0: i32) -> (i32, i32) {
    %c0_i32 = arith.constant 0 : i32
    %c0_i32_0 = arith.constant 0 : i32
    %c0_i32_1 = arith.constant 0 : i32
    return %c0_i32, %c0_i32_0 : i32, i32
  }
  func.func @transform_6(%arg0: i32) -> (i32, i32, i32) {
    %c0_i32 = arith.constant 0 : i32
    %c0_i32_0 = arith.constant 0 : i32
    %c0_i32_1 = arith.constant 0 : i32
    return %arg0, %c0_i32, %c0_i32_0 : i32, i32, i32
  }
}

</mosaic_0001>

<bundles_post_ra>
// kernel: tpu_custom_call.1
= control target key start
LH: loop header
LB: loop body
LE: loop exit
PB: predicated region body
PF: predicated region fallthrough
CT: control target
= control target key end

     0   :  { %s1097_s0 = inlined_call_operand.vmem [shape: f32[2,4,256], index: 0, kind: input, shape index: {}]   ;;  %s1098_s1 = inlined_call_operand.vmem [shape: f32[4,64], index: 1, kind: input, shape index: {}]   ;;  %s1099_s2 = inlined_call_operand.vmem [shape: f32[64,16], index: 2, kind: input, shape index: {}]   ;;  %s1100_s3 = inlined_call_operand.vmem [shape: f32[16,4], index: 3, kind: input, shape index: {}]   ;;  %s1101_s4 = inlined_call_operand.vmem [shape: f32[1,16], index: 4, kind: input, shape index: {}]   ;;  %s1102_s5 = inlined_call_operand.vmem [shape: f32[1,16], index: 5, kind: input, shape index: {}]   ;;  %s1103_s6 = inlined_call_operand.hbm [shape: f32[2,4,256], index: 6, kind: output, shape index: {}]  }
   0x1   :  { %v927_v0 = vld [vmem:[%s1097_s0] sm:$0xff]  ;;  %v932_v1 = vld [vmem:[%s1097_s0 + $0x8] sm:$0xff] }
   0x2   :  { %28 = vst [vmem:[#allocation1] ss:$2 sm:$0xff] %v927_v0 }
   0x3   :  { %11 = vsyncpa [#allocation3], 0  ;;  %32 = vst [vmem:[#allocation1 + $0x10] ss:$2 sm:$0xff] %v932_v1  ;;  %vm39_vm0 = vcmask 1043456   ;;  %v67_v19 = vlaneseq  ;;  %vm71_vm1 = vcmask 1041409  }
   0x4   :  { %v52_v12 = vld [vmem:[%s1098_s1] sm:$0xf]  ;;  %vm73_vm2 = vcmask 31744   ;;  %vm302_vm3 = vcmask 64512   ;;  %vm304_vm4 = vcmask 97280   ;;  %vm306_vm5 = vcmask 130048  }
   0x5   :  { %v77_v13 = vsel %vm39_vm0, %v52_v12, 0  ;;  %v68_v20 = vand.u32 127, %v67_v19  ;;  %vm308_vm6 = vcmask 162816   ;;  %vm310_vm7 = vcmask 195584   ;;  %s828_s0 = sshll.u32 %s1103_s6, 4  ;;  %s887_s25 = smov 128   ;;  %s829_s0 = int_to_ptr.hbm [resolvable:$true] %s828_s0 }
   0x6   :  { %v94_v14 = vand.u32 4294901760, %v77_v13  ;;  %vm312_vm8 = vcmask 228352   ;;  %vm314_vm9 = vcmask 261120   ;;  %vm316_vm10 = vcmask 293888   ;;  %s888_s1 = smov 8  }
   0x7   :  { %v226_v21 = vadd.s32 4294967292, %v68_v20  ;;  %v231_v22 = vadd.s32 4294967288, %v68_v20  ;;  %v236_v23 = vadd.s32 4294967284, %v68_v20  ;;  %v241_v24 = vadd.s32 4294967280, %v68_v20 }
   0x8   :  { %v121_v15 = vsub.f32 %v77_v13, %v94_v14  ;;  %171 = vmatpush.msra.mxu3 %v94_v14  ;;  %95 = vmatpush.msra.mxu0 %v94_v14  ;;  %v246_v26 = vadd.s32 4294967276, %v68_v20  ;;  %v251_v27 = vadd.s32 4294967272, %v68_v20  ;;  %v256_v28 = vadd.s32 4294967268, %v68_v20 }
   0x9   :  { %v29_v2 = vld.sshfl [vmem:[#allocation1] sm:$0xff pattern:$0x75316420]  ;;  %v30_v3 = vld.sshfl [vmem:[#allocation1 + $0x8] sm:$0xff pattern:$0x75316420] }
   0xa   :  { %v40_v4 = vsel %vm39_vm0, %v29_v2, 0.0  ;;  %v41_v5 = vsel %vm39_vm0, %v30_v3, 0.0  ;;  %v33_v7 = vld.sshfl [vmem:[#allocation1 + $0x10] sm:$0xff pattern:$0x75316420]  ;;  %v122_v16 = vand.u32 4294901760, %v121_v15  ;;  %148 = vmatpush.msra.mxu2 %v121_v15 }
   0xb   :  { %v42_v6 = vadd.f32 %v41_v5, %v40_v4  ;;  %v34_v8 = vld.sshfl [vmem:[#allocation1 + $0x18] sm:$0xff pattern:$0x75316420]  ;;  %v45_v9 = vsel %vm39_vm0, %v33_v7, 0.0  ;;  %v940_v29 = vadd.s32 4294967264, %v68_v20  ;;  %v944_v31 = vadd.s32 4294967260, %v68_v20 }
   0xc   :  { %v46_v10 = vsel %vm39_vm0, %v34_v8, 0.0  ;;  %v123_v17 = vsub.f32 %v121_v15, %v122_v16  ;;  %197 = vmatpush.msrb.mxu0 %v122_v16  ;;  %v946_v32 = vadd.s32 4294967256, %v68_v20  ;;  %v948_v33 = vadd.s32 4294967252, %v68_v20 }
   0xd   :  { %43 = vadd.xlane.f32.xlu0 %v42_v6  ;;  %v47_v11 = vadd.f32 %v46_v10, %v45_v9  ;;  %v950_v34 = vadd.s32 4294967248, %v68_v20  ;;  %v952_v35 = vadd.s32 4294967244, %v68_v20  ;;  %v954_v36 = vadd.s32 4294967240, %v68_v20 }
   0xe   :  { %v124_v18 = vand.u32 4294901760, %v123_v17  ;;  %v956_v37 = vadd.s32 4294967236, %v68_v20  ;;  %vm318_vm11 = vcmask 326656   ;;  %vm320_vm12 = vcmask 359424  }
   0xf   :  { %vm322_vm13 = vcmask 392192   ;;  %vm324_vm14 = vcmask 424960   ;;  %vm326_vm15 = vcmask 457728   ;;  %vm328_vm0 = vcmask 490496  }
  0x10   :  { %125 = vmatpush.msra.mxu1 %v124_v18 }
  0x12   :  { %219 = vmatpush.msrb.mxu1 %v94_v14 }
  0x15   :  { %48 = vadd.xlane.f32.xlu0 %v47_v11 }
  0x80   :  { %v44_v25 = vpop.xlane.xlu0 %43 }
  0x81   :  { %v942_v30 = vmul.f32 0.00390625, %v44_v25 }
  0x83   :  { %v227_v38 = vperm.slane %v942_v30, %v226_v21  ;;  %v232_v39 = vperm.slane %v942_v30, %v231_v22  ;;  %v237_v40 = vperm.slane %v942_v30, %v236_v23  ;;  %v242_v41 = vperm.slane %v942_v30, %v241_v24 }
  0x84   :  { %v247_v42 = vperm.slane %v942_v30, %v246_v26  ;;  %v252_v43 = vperm.slane %v942_v30, %v251_v27  ;;  %v257_v44 = vperm.slane %v942_v30, %v256_v28  ;;  %v262_v45 = vperm.slane %v942_v30, %v940_v29 }
  0x85   :  { %v267_v46 = vperm.slane %v942_v30, %v944_v31  ;;  %v272_v47 = vperm.slane %v942_v30, %v946_v32  ;;  %v277_v48 = vperm.slane %v942_v30, %v948_v33  ;;  %v282_v49 = vperm.slane %v942_v30, %v950_v34 }
  0x86   :  { %v287_v50 = vperm.slane %v942_v30, %v952_v35  ;;  %v292_v51 = vperm.slane %v942_v30, %v954_v36  ;;  %v297_v52 = vperm.slane %v942_v30, %v956_v37  ;;  %v69_v55 = vperm.slane %v942_v30, %v68_v20 }
  0x88   :  { %v49_v53 = vpop.xlane.xlu0 %48 }
  0x89   :  { %v51_v54 = vmul.f32 0.00390625, %v49_v53  ;;  %v58_v53 = vld [vmem:[%s1099_s2 + $0x28] sm:$0xff] }
  0x8b   :  { %v70_v56 = vperm.slane %v51_v54, %v68_v20  ;;  %v228_v57 = vperm.slane %v51_v54, %v226_v21  ;;  %v233_v58 = vperm.slane %v51_v54, %v231_v22  ;;  %v238_v59 = vperm.slane %v51_v54, %v236_v23 }
  0x8c   :  { %v243_v60 = vperm.slane %v51_v54, %v241_v24  ;;  %v248_v61 = vperm.slane %v51_v54, %v246_v26  ;;  %v253_v62 = vperm.slane %v51_v54, %v251_v27  ;;  %v258_v63 = vperm.slane %v51_v54, %v256_v28 }
  0x8d   :  { %v72_v2 = vsel %vm71_vm1, %v70_v56, %v69_v55  ;;  %v229_v3 = vsel %vm71_vm1, %v228_v57, %v227_v38  ;;  %v234_v4 = vsel %vm71_vm1, %v233_v58, %v232_v39  ;;  %v239_v5 = vsel %vm71_vm1, %v238_v59, %v237_v40  ;;  %v57_v57 = vld [vmem:[%s1099_s2 + $0x20] sm:$0xff] }
  0x8e   :  { %v74_v6 = vsel %vm73_vm2, %v72_v2, 0  ;;  %v244_v7 = vsel %vm71_vm1, %v243_v60, %v242_v41  ;;  %v249_v8 = vsel %vm71_vm1, %v248_v61, %v247_v42  ;;  %v254_v9 = vsel %vm71_vm1, %v253_v62, %v252_v43  ;;  %v56_v62 = vld [vmem:[%s1099_s2 + $0x18] sm:$0xff] }
  0x8f   :  { %v96_v10 = vand.u32 4294901760, %v74_v6  ;;  %v301_v11 = vsel %vm73_vm2, %v72_v2, %v229_v3  ;;  %v259_v12 = vsel %vm71_vm1, %v258_v63, %v257_v44  ;;  %v263_v13 = vperm.slane %v51_v54, %v940_v29 }
  0x90   :  { %v303_v14 = vsel %vm302_vm3, %v301_v11, %v234_v4  ;;  %v268_v15 = vperm.slane %v51_v54, %v944_v31  ;;  %v273_v16 = vperm.slane %v51_v54, %v946_v32  ;;  %v278_v17 = vperm.slane %v51_v54, %v948_v33 }
  0x91   :  { %127 = vmatmul.f32.vlgmr.msra.gmra.mxu1 %v96_v10  ;;  %v305_v18 = vsel %vm304_vm4, %v303_v14, %v239_v5  ;;  %v97_v20 = vsub.f32 %v74_v6, %v96_v10  ;;  %v264_v21 = vsel %vm71_vm1, %v263_v13, %v262_v45  ;;  %v283_v22 = vperm.slane %v51_v54, %v950_v34  ;;  %v55_v6 = vld [vmem:[%s1099_s2 + $0x10] sm:$0xff] }
  0x92   :  { %v307_v23 = vsel %vm306_vm5, %v305_v18, %v244_v7  ;;  %v269_v24 = vsel %vm71_vm1, %v268_v15, %v267_v46  ;;  %v274_v25 = vsel %vm71_vm1, %v273_v16, %v272_v47  ;;  %v279_v26 = vsel %vm71_vm1, %v278_v17, %v277_v48  ;;  %v60_v48 = vld [vmem:[%s1099_s2 + $0x38] sm:$0xff] }
  0x93   :  { %v309_v27 = vsel %vm308_vm6, %v307_v23, %v249_v8  ;;  %151 = vmatmul.f32.vlgmr.msra.gmra.mxu2 %v97_v20  ;;  %v98_v28 = vand.u32 4294901760, %v97_v20  ;;  %v284_v29 = vsel %vm71_vm1, %v283_v22, %v282_v49  ;;  %v288_v30 = vperm.slane %v51_v54, %v952_v35  ;;  %v54_v23 = vld [vmem:[%s1099_s2 + $0x8] sm:$0xff] }
  0x94   :  { %v311_v31 = vsel %vm310_vm7, %v309_v27, %v254_v9  ;;  %v293_v32 = vperm.slane %v51_v54, %v954_v36  ;;  %v298_v33 = vperm.slane %v51_v54, %v956_v37  ;;  %v1020_v49 = vand.u32 4294901760, %v60_v48 }
  0x95   :  { %175 = vmatmul.f32.vlgmr.msra.gmra.mxu3 %v98_v28  ;;  %v99_v34 = vsub.f32 %v97_v20, %v98_v28  ;;  %v289_v38 = vsel %vm71_vm1, %v288_v30, %v287_v50  ;;  %v313_v39 = vsel %vm312_vm8, %v311_v31, %v259_v12  ;;  %v59_v50 = vld [vmem:[%s1099_s2 + $0x30] sm:$0xff]  ;;  %v1039_v56 = vand.u32 4294901760, %v58_v53 }
  0x96   :  { %v294_v40 = vsel %vm71_vm1, %v293_v32, %v292_v51  ;;  %v299_v41 = vsel %vm71_vm1, %v298_v33, %v297_v52  ;;  %v315_v35 = vsel %vm314_vm9, %v313_v39, %v264_v21  ;;  %v1026_v51 = vsub.f32 %v60_v48, %v1020_v49  ;;  %344 = vmatpush.msrb.mxu2 %v1020_v49 }
  0x97   :  { %v100_v42 = vand.u32 4294901760, %v99_v34  ;;  %v317_v43 = vsel %vm316_vm10, %v315_v35, %v269_v24  ;;  %v1028_v52 = vand.u32 4294901760, %v59_v50  ;;  %476 = vmatpush.msra.mxu1 %v1020_v49  ;;  %v389_v60 = vsub.f32 %v58_v53, %v1039_v56 }
  0x98   :  { %v319_v36 = vsel %vm318_vm11, %v317_v43, %v274_v25  ;;  %v378_v54 = vand.u32 4294901760, %v1026_v51  ;;  %v1050_v61 = vand.u32 4294901760, %v57_v57  ;;  %v351_v5 = vand.u32 4294901760, %v56_v62  ;;  %v53_v25 = vld [vmem:[%s1099_s2] sm:$0xff] }
  0x99   :  { %101 = vmatmul.f32.vlgmr.msra.gmra.mxu0 %v100_v42  ;;  %221 = vmatmul.f32.vlgmr.msrb.gmra.mxu1 %v96_v10  ;;  %v321_v37 = vsel %vm320_vm12, %v319_v36, %v279_v26  ;;  %v1037_v55 = vsub.f32 %v59_v50, %v1028_v52  ;;  %v390_v3 = vand.u32 4294901760, %v389_v60  ;;  %v355_v24 = vand.u32 4294901760, %v54_v23 }
  0x9a   :  { %v323_v44 = vsel %vm322_vm13, %v321_v37, %v284_v29  ;;  %439 = vmatpush.msra.mxu0 %v1026_v51  ;;  %346 = vmatpush.msrb.mxu2 %v1028_v52  ;;  %v379_v58 = vsub.f32 %v1026_v51, %v378_v54  ;;  %v395_v4 = vsub.f32 %v57_v57, %v1050_v61  ;;  %v357_v27 = vand.u32 4294901760, %v53_v25 }
  0x9b   :  { %v325_v45 = vsel %vm324_vm14, %v323_v44, %v289_v38  ;;  %478 = vmatpush.msra.mxu1 %v1028_v52  ;;  %v384_v59 = vand.u32 4294901760, %v1037_v55  ;;  %v391_v8 = vsub.f32 %v389_v60, %v390_v3  ;;  %v401_v11 = vsub.f32 %v56_v62, %v351_v5 }
  0x9c   :  { %v327_v46 = vsel %vm326_vm15, %v325_v45, %v294_v40  ;;  %442 = vmatpush.msra.mxu0 %v1037_v55  ;;  %348 = vmatpush.msrb.mxu2 %v1039_v56  ;;  %v380_v63 = vand.u32 4294901760, %v379_v58  ;;  %v396_v9 = vand.u32 4294901760, %v395_v4  ;;  %v413_v26 = vsub.f32 %v54_v23, %v355_v24 }
  0x9d   :  { %v1015_v47 = vsel %vm328_vm0, %v327_v46, %v299_v41  ;;  %480 = vmatpush.msra.mxu1 %v1039_v56  ;;  %v385_v2 = vsub.f32 %v1037_v55, %v384_v59  ;;  %v392_v12 = vand.u32 4294901760, %v391_v8  ;;  %v402_v15 = vand.u32 4294901760, %v401_v11 }
  0x9e   :  { %445 = vmatpush.msra.mxu0 %v389_v60  ;;  %350 = vmatpush.msrb.mxu2 %v1050_v61  ;;  %v397_v13 = vsub.f32 %v395_v4, %v396_v9  ;;  %v414_v28 = vand.u32 4294901760, %v413_v26  ;;  %v419_v29 = vsub.f32 %v53_v25, %v357_v27  ;;  %vm331_vm1 = vcmask 523264  }
  0x9f   :  { %482 = vmatpush.msra.mxu1 %v1050_v61  ;;  %381 = vmatpush.msrb.mxu3 %v380_v63  ;;  %v386_v7 = vand.u32 4294901760, %v385_v2  ;;  %v403_v18 = vsub.f32 %v401_v11, %v402_v15  ;;  %vm572_vm2 = vcmask 123904  }
  0xa0   :  { %448 = vmatpush.msra.mxu0 %v395_v4  ;;  %352 = vmatpush.msrb.mxu2 %v351_v5  ;;  %v398_v16 = vand.u32 4294901760, %v397_v13  ;;  %v415_v30 = vsub.f32 %v413_v26, %v414_v28  ;;  %v420_v31 = vand.u32 4294901760, %v419_v29 }
  0xa1   :  { %199 = vmatmul.f32.vlgmr.msrb.gmra.mxu0 %v96_v10  ;;  %v353_v10 = vand.u32 4294901760, %v55_v6  ;;  %484 = vmatpush.msra.mxu1 %v351_v5  ;;  %v404_v21 = vand.u32 4294901760, %v403_v18 }
  0xa2   :  { %387 = vmatpush.msrb.mxu3 %v386_v7  ;;  %451 = vmatpush.msra.mxu0 %v401_v11  ;;  %v416_v32 = vand.u32 4294901760, %v415_v30  ;;  %v421_v33 = vsub.f32 %v419_v29, %v420_v31 }
  0xa3   :  { %v407_v14 = vsub.f32 %v55_v6, %v353_v10  ;;  %354 = vmatpush.msrb.mxu2 %v353_v10  ;;  %486 = vmatpush.msra.mxu1 %v353_v10 }
  0xa4   :  { %393 = vmatpush.msrb.mxu3 %v392_v12  ;;  %v422_v34 = vand.u32 4294901760, %v421_v33 }
  0xa5   :  { %v408_v17 = vand.u32 4294901760, %v407_v14  ;;  %454 = vmatpush.msra.mxu0 %v407_v14  ;;  %356 = vmatpush.msrb.mxu2 %v355_v24 }
  0xa6   :  { %399 = vmatpush.msrb.mxu3 %v398_v16  ;;  %488 = vmatpush.msra.mxu1 %v355_v24  ;;  %v61_v16 = vld [vmem:[%s1100_s3] sm:$0xff] }
  0xa7   :  { %v409_v20 = vsub.f32 %v407_v14, %v408_v17  ;;  %457 = vmatpush.msra.mxu0 %v413_v26  ;;  %358 = vmatpush.msrb.mxu2 %v357_v27  ;;  %v630_v18 = vand.u32 4294901760, %v61_v16 }
  0xa8   :  { %405 = vmatpush.msrb.mxu3 %v404_v21  ;;  %490 = vmatpush.msra.mxu1 %v357_v27 }
  0xa9   :  { %v410_v22 = vand.u32 4294901760, %v409_v20  ;;  %509 = vmatpush.msra.mxu2 %v378_v54  ;;  %460 = vmatpush.msra.mxu0 %v419_v29  ;;  %v662_v21 = vsub.f32 %v61_v16, %v630_v18 }
  0xab   :  { %411 = vmatpush.msrb.mxu3 %v410_v22  ;;  %513 = vmatpush.msra.mxu2 %v384_v59  ;;  %v663_v23 = vand.u32 4294901760, %v662_v21 }
  0xad   :  { %517 = vmatpush.msra.mxu2 %v390_v3  ;;  %417 = vmatpush.msrb.mxu3 %v416_v32  ;;  %v884_v3 = vmov 16.0   ;;  %v664_v26 = vsub.f32 %v662_v21, %v663_v23 }
  0xae   :  { %850 = vrcp.f32 %v884_v3 }
  0xaf   :  { %521 = vmatpush.msra.mxu2 %v396_v9  ;;  %423 = vmatpush.msrb.mxu3 %v422_v34  ;;  %v665_v29 = vand.u32 4294901760, %v664_v26 }
  0xb1   :  { %552 = vmatpush.msra.mxu3 %v1020_v49  ;;  %525 = vmatpush.msra.mxu2 %v402_v15  ;;  %v62_v15 = vld [vmem:[%s1100_s3 + $0x8] sm:$0xff] }
  0xb3   :  { %554 = vmatpush.msra.mxu3 %v1028_v52  ;;  %529 = vmatpush.msra.mxu2 %v408_v17  ;;  %v628_v17 = vand.u32 4294901760, %v62_v15 }
  0xb4   :  { %v851_v4 = vpop.eup %850 }
  0xb5   :  { %556 = vmatpush.msra.mxu3 %v1039_v56  ;;  %533 = vmatpush.msra.mxu2 %v414_v28  ;;  %vm581_vm3 = vweird.f32 %v851_v4  ;;  %v656_v20 = vsub.f32 %v62_v15, %v628_v17 }
  0xb6   :  { %629 = vmatpush.msrb.mxu0 %v628_v17 }
  0xb7   :  { %558 = vmatpush.msra.mxu3 %v1050_v61  ;;  %537 = vmatpush.msra.mxu2 %v420_v31  ;;  %v657_v22 = vand.u32 4294901760, %v656_v20 }
  0xb8   :  { %631 = vmatpush.msrb.mxu0 %v630_v18 }
  0xb9   :  { %560 = vmatpush.msra.mxu3 %v351_v5  ;;  %v577_v5 = vmul.f32 16.0, %v851_v4  ;;  %v658_v25 = vsub.f32 %v656_v20, %v657_v22 }
  0xbb   :  { %562 = vmatpush.msra.mxu3 %v353_v10  ;;  %v578_v6 = vsub.f32 1.0, %v577_v5  ;;  %v659_v28 = vand.u32 4294901760, %v658_v25 }
  0xbd   :  { %564 = vmatpush.msra.mxu3 %v355_v24  ;;  %v579_v7 = vmul.f32 %v851_v4, %v578_v6  ;;  %660 = vmatpush.msrb.mxu1 %v659_v28 }
  0xbf   :  { %566 = vmatpush.msra.mxu3 %v357_v27  ;;  %v580_v8 = vadd.f32 %v851_v4, %v579_v7  ;;  %666 = vmatpush.msrb.mxu1 %v665_v29 }
  0xc1   :  { %v582_v9 = vsel %vm581_vm3, %v851_v4, %v580_v8 }
 0x10e   :  { %v128_v38 = vpop.f32.mrf.mxu1 }
 0x116   :  { %v102_v39 = vpop.f32.mrf.mxu0  ;;  %v152_v41 = vpop.f32.mrf.mxu2 }
 0x117   :  { %v129_v40 = vadd.f32 %v128_v38, %v102_v39  ;;  %v222_v44 = vpop.f32.mrf.mxu1 }
 0x118   :  { %v176_v42 = vpop.f32.mrf.mxu3 }
 0x119   :  { %v153_v35 = vadd.f32 %v152_v41, %v129_v40  ;;  %v848_v40 = vld [vmem:[%s1101_s4] ss:$0 sm:$0xff]  ;;  %s886_s4 = smov [#allocation2]  }
 0x11b   :  { %v177_v43 = vadd.f32 %v176_v42, %v153_v35  ;;  %v849_v42 = vld [vmem:[%s1102_s5] ss:$0 sm:$0xff]  ;;  %s826_s5 = sshll.u32 %s886_s4, 4  ;;  %s827_s5 = int_to_ptr.vmem [resolvable:$true] %s826_s5 }
 0x11e   :  { %v200_v36 = vpop.f32.mrf.mxu0 }
 0x11f   :  { %v201_v37 = vadd.f32 %v200_v36, %v177_v43 }
 0x121   :  { %v223_v45 = vadd.f32 %v222_v44, %v201_v37 }
 0x123   :  { %v330_v46 = vmul.f32 %v1015_v47, %v223_v45 }
 0x125   :  { %v333_v48 = vsel %vm331_vm1, %v330_v46, 0 }
 0x126   :  { %v359_v49 = vand.u32 4294901760, %v333_v48 }
 0x128   :  { %425 = vmatmul.f32.vlgmr.msrb.gmra.mxu3 %v359_v49  ;;  %v360_v50 = vsub.f32 %v333_v48, %v359_v49 }
 0x129   :  { %765 = vmatpush.msrb.mxu3 %v628_v17 }
 0x12a   :  { %463 = vmatmul.f32.vlgmr.msra.gmra.mxu0 %v360_v50  ;;  %v361_v51 = vand.u32 4294901760, %v360_v50 }
 0x12b   :  { %767 = vmatpush.msrb.mxu3 %v630_v18  ;;  %688 = vmatpush.msra.mxu0 %v656_v20 }
 0x12c   :  { %494 = vmatmul.f32.vlgmr.msra.gmra.mxu1 %v361_v51  ;;  %v362_v52 = vsub.f32 %v360_v50, %v361_v51  ;;  %v794_v51 = vshrl.u32 %v67_v19, 7 }
 0x12d   :  { %691 = vmatpush.msra.mxu0 %v662_v21  ;;  %713 = vmatpush.msra.mxu1 %v628_v17 }
 0x12e   :  { %v363_v53 = vand.u32 4294901760, %v362_v52  ;;  %846 = vset.pattern.permute.xlu2 %v794_v51  ;;  %847 = vset.pattern.permute.xlu0 %v794_v51 }
 0x12f   :  { %715 = vmatpush.msra.mxu1 %v630_v18 }
 0x130   :  { %364 = vmatmul.f32.vlgmr.msrb.gmra.mxu2 %v363_v53  ;;  %568 = vmatmul.f32.vlgmr.msra.gmra.mxu3 %v359_v49 }
 0x131   :  { %740 = vmatpush.msrb.mxu2 %v657_v22 }
 0x133   :  { %744 = vmatpush.msrb.mxu2 %v663_v23 }
 0x138   :  { %539 = vmatmul.f32.vlgmr.msra.gmra.mxu2 %v359_v49 }
 0x1a7   :  { %v464_v57 = vpop.f32.mrf.mxu0 }
 0x1a9   :  { %v495_v59 = vpop.f32.mrf.mxu1 }
 0x1ab   :  { %v426_v54 = vpop.f32.mrf.mxu3 }
 0x1b3   :  { %v365_v55 = vpop.f32.mrf.mxu2  ;;  %v569_v62 = vpop.f32.mrf.mxu3 }
 0x1b4   :  { %v427_v56 = vadd.f32 %v426_v54, %v365_v55 }
 0x1b6   :  { %v465_v58 = vadd.f32 %v464_v57, %v427_v56 }
 0x1b8   :  { %v496_v60 = vadd.f32 %v495_v59, %v465_v58 }
 0x1bb   :  { %v540_v47 = vpop.f32.mrf.mxu2 }
 0x1bc   :  { %v541_v61 = vadd.f32 %v540_v47, %v496_v60 }
 0x1be   :  { %v570_v63 = vadd.f32 %v569_v62, %v541_v61 }
 0x1c0   :  { %v573_v2 = vsel %vm572_vm2, %v570_v63, 0.0 }
 0x1c1   :  { %574 = vadd.xlane.f32.xlu1 %v573_v2 }
 0x234   :  { %v575_v10 = vpop.xlane.xlu1 %574 }
 0x235   :  { %v583_v11 = vmul.f32 %v582_v9, %v575_v10 }
 0x237   :  { %v584_v12 = vsub.f32 %v570_v63, %v583_v11 }
 0x239   :  { %v585_v13 = vmul.f32 %v584_v12, %v584_v12 }
 0x23b   :  { %v586_v14 = vsel %vm572_vm2, %v585_v13, 0.0 }
 0x23c   :  { %587 = vadd.xlane.f32.xlu1 %v586_v14  ;;  %v885_v14 = vmov 839922192  }
 0x23d   :  { %v809_v15 = vunpack.c.l.s4 %v885_v14 }
 0x23f   :  { %v810_v16 = vunpack.c.0.s8 %v809_v15 }
 0x2af   :  { %v588_v24 = vpop.xlane.xlu1 %587 }
 0x2b0   :  { %v589_v27 = vmul.f32 %v588_v24, %v582_v9 }
 0x2b2   :  { %v590_v30 = vadd.f32 1e-05, %v589_v27 }
 0x2b4   :  { %852 = vrsqrt.f32 %v590_v30  ;;  %vm597_vm6 = vweird.f32 %v590_v30 }
 0x2ba   :  { %v853_v31 = vpop.eup %852 }
 0x2bb   :  { %v592_v32 = vmul.f32 %v853_v31, %v590_v30  ;;  %vm598_vm4 = vweird.f32 %v853_v31 }
 0x2bc   :  { %vm599_vm7 = vmor %vm597_vm6, %vm598_vm4 }
 0x2bd   :  { %v593_v33 = vmul.f32 %v853_v31, %v592_v32 }
 0x2bf   :  { %v594_v34 = vmul.f32 0.5, %v593_v33 }
 0x2c1   :  { %v595_v38 = vsub.f32 1.5, %v594_v34 }
 0x2c3   :  { %v596_v39 = vmul.f32 %v853_v31, %v595_v38 }
 0x2c5   :  { %v600_v41 = vsel %vm599_vm7, %v853_v31, %v596_v39 }
 0x2c6   :  { %v601_v35 = vmul.f32 %v600_v41, %v584_v12 }
 0x2c8   :  { %v605_v43 = vmul.f32 %v848_v40, %v601_v35 }
 0x2ca   :  { %v609_v36 = vadd.f32 %v849_v42, %v605_v43 }
 0x2cc   :  { %v610_v37 = vmax.f32 %v609_v36, 0.0 }
 0x2ce   :  { %v612_v44 = vsel %vm306_vm5, %v610_v37, 0 }
 0x2cf   :  { %v632_v45 = vand.u32 4294901760, %v612_v44 }
 0x2d1   :  { %v633_v46 = vsub.f32 %v612_v44, %v632_v45  ;;  %668 = vmatmul.f32.vlgmr.msrb.gmra.mxu1 %v632_v45  ;;  %746 = vmatmul.f32.vlgmr.msrb.gmra.mxu2 %v632_v45 }
 0x2d2   :  { %769 = vmatmul.f32.vlgmr.msrb.gmra.mxu3 %v632_v45 }
 0x2d3   :  { %v634_v48 = vand.u32 4294901760, %v633_v46 }
 0x2d5   :  { %v635_v49 = vsub.f32 %v633_v46, %v634_v48 }
 0x2d7   :  { %v636_v50 = vand.u32 4294901760, %v635_v49 }
 0x2d9   :  { %637 = vmatmul.f32.vlgmr.msrb.gmra.mxu0 %v636_v50  ;;  %719 = vmatmul.f32.vlgmr.msra.gmra.mxu1 %v634_v48 }
 0x2e1   :  { %694 = vmatmul.f32.vlgmr.msra.gmra.mxu0 %v633_v46 }
 0x34e   :  { %v669_v52 = vpop.f32.mrf.mxu1 }
 0x354   :  { %v747_v59 = vpop.f32.mrf.mxu2 }
 0x355   :  { %v770_v47 = vpop.f32.mrf.mxu3 }
 0x356   :  { %v638_v53 = vpop.f32.mrf.mxu0  ;;  %v720_v57 = vpop.f32.mrf.mxu1 }
 0x357   :  { %v670_v54 = vadd.f32 %v669_v52, %v638_v53 }
 0x35e   :  { %v695_v55 = vpop.f32.mrf.mxu0 }
 0x35f   :  { %v696_v56 = vadd.f32 %v695_v55, %v670_v54 }
 0x361   :  { %v721_v58 = vadd.f32 %v720_v57, %v696_v56 }
 0x363   :  { %v748_v60 = vadd.f32 %v747_v59, %v721_v58 }
 0x365   :  { %v771_v61 = vadd.f32 %v770_v47, %v748_v60 }
 0x367   :  { %v840_v62 = vmul.f32 -1.442695, %v771_v61 }
 0x369   :  { %854 = vpow2.f32 %v840_v62 }
 0x36f   :  { %v855_v63 = vpop.eup %854 }
 0x370   :  { %v776_v2 = vadd.f32 1.0, %v855_v63 }
 0x372   :  { %856 = vrcp.f32 %v776_v2  ;;  %v788_v5 = vand.u32 2147483648, %v776_v2  ;;  %v786_v7 = vand.u32 2147483647, %v776_v2  ;;  %vm782_vm8 = vweird.f32 %v776_v2 }
 0x374   :  { %v789_v9 = vor.u32 1.1754944e-38, %v788_v5  ;;  %vm787_vm10 = vcmp.eq.f32.partialorder %v786_v7, 8.507059e+37 }
 0x378   :  { %v857_v3 = vpop.eup %856 }
 0x379   :  { %v778_v19 = vmul.f32 %v857_v3, %v776_v2  ;;  %vm783_vm5 = vweird.f32 %v857_v3 }
 0x37a   :  { %vm784_vm9 = vmor %vm782_vm8, %vm783_vm5 }
 0x37b   :  { %v779_v4 = vsub.f32 1.0, %v778_v19 }
 0x37d   :  { %v780_v6 = vmul.f32 %v857_v3, %v779_v4 }
 0x37f   :  { %v781_v8 = vadd.f32 %v857_v3, %v780_v6 }
 0x381   :  { %v785_v10 = vsel %vm784_vm9, %v857_v3, %v781_v8 }
 0x382   :  { %v790_v11 = vsel %vm787_vm10, %v789_v9, %v785_v10 }
 0x383   :  { %v792_v12 = vperm.slane %v790_v11, 0  ;;  %v799_v13 = vperm.slane %v790_v11, 1 }
 0x385   :  { %797 = vperm.xlu2 %846, %v792_v12  }
 0x38d   :  { %804 = vperm.xlu2 %846, %v799_v13  }
 0x3df   :  { %v798_v17 = vpop.permute.xlu2 %797 }
 0x3e0   :  { %v811_v18 = vperm.slane %v798_v17, %v810_v16 }
 0x3e2   :  { %v818_v20 = vmul.f32 %v811_v18, %v927_v0 }
 0x3e4   :  { %820 = vst [vmem:[#allocation2] sm:$0xff] %v818_v20 }
 0x3e7   :  { %v805_v21 = vpop.permute.xlu2 %804 }
 0x3e8   :  { %v815_v22 = vperm.slane %v805_v21, %v810_v16 }
 0x3ea   :  { %v819_v23 = vmul.f32 %v815_v22, %v932_v1 }
 0x3ec   :  { %821 = vst [vmem:[#allocation2 + $0x8] sm:$0xff] %v819_v23 }
 0x3ed   :  { %834 = dma.vmem_to_hbm [thread:$0]  %s827_s5, 256, %s829_s0, [#allocation3], %s887_s25, %s887_s25, %s888_s1  }
 0x3ee   :  { %882 = dma.done.wait [#allocation3], 256  }
 0x3ef   :  { %883 = vsyncadd [#allocation3], 4294967040 }
 0x3f0   :  { %839 = vsyncpa [#allocation3], 1 }

</bundles_post_ra>
